<compile_context>
chip_gen: v5e
topology: v5e:2x2
jax: 0.10.0
libtpu: 0.0.40
codegen_flags: <defaults>
</compile_context>

<pallas_src>
import jax
import jax.numpy as jnp
from jax.experimental import pallas as pl
from jax.experimental.pallas import tpu as pltpu

EPS = 1e-5
LANE = 128


def _round_up(x, m):
    return (x + m - 1) // m * m


def _pick_row_tile(h, cap=256):
    """Largest multiple of 8 dividing h, capped (MXU M-util / halo amortization)."""
    best = None
    for t in range(8, min(h, cap) + 1, 8):
        if h % t == 0:
            best = t
    return best


def _pick_col_tile(w, cap=16):
    """Largest divisor of w <= cap (bounds the Toeplitz K waste to 3/(tw+2))."""
    best = 1
    for t in range(1, min(w, cap) + 1):
        if w % t == 0:
            best = t
    return best


def _conv_stats_kernel(x_ref, wb_ref, out_ref, sum_ref, sq_ref):
    # x_ref:   (1, tr+8, Kt)  bf16   tile rows incl. 2 halo rows (+ zero fill)
    # wb_ref:  (3, Kt, Ntp)   bf16   banded (block-Toeplitz) weights, 1 per dy
    # out_ref: (1, tr, Ntp)   f32    conv output tile (lane-dense, tail pad only)
    # sum_ref: (1, 1, Ntp)    f32    per-tile sum over rows (partial BN stats)
    # sq_ref:  (1, 1, Ntp)    f32    per-tile sum of squares over rows
    tr = out_ref.shape[1]

    # 3 banded matmuls (one per vertical tap dy): K = (tw+2)*Cin, N = tw*Cout.
    # NOTE: the dy=1/2 operands are sublane-offset views; Mosaic may relayout.
    acc = jnp.dot(x_ref[0, 0:tr, :], wb_ref[0],
                  preferred_element_type=jnp.float32)
    acc = acc + jnp.dot(x_ref[0, 1:tr + 1, :], wb_ref[1],
                        preferred_element_type=jnp.float32)
    acc = acc + jnp.dot(x_ref[0, 2:tr + 2, :], wb_ref[2],
                        preferred_element_type=jnp.float32)

    out_ref[0] = acc
    # Partial BatchNorm statistics (reduced over this tile's rows; the pixel-
    # and tile-reductions finish on tiny tensors in the wrapper).
    sum_ref[0] = jnp.sum(acc, axis=0, keepdims=True)
    sq_ref[0] = jnp.sum(acc * acc, axis=0, keepdims=True)


def conv3bn_forward(x_nchw, w_oihw, bias, gamma, beta, *, tr=None, tw=None):
    """x_nchw: (N, Cin, H, W) f32 -> (N, Cout, H, W) f32.

    `bias` is accepted for API parity with nn.Conv2d but is NOT applied:
    training-mode BatchNorm subtracts the batch mean, which absorbs it exactly.
    """
    N, Cin, H, W = x_nchw.shape
    Cout = w_oihw.shape[0]

    if tr is None:
        tr = _pick_row_tile(H)
    if tw is None:
        tw = _pick_col_tile(W)
    assert tr is not None and H % tr == 0 and tr % 8 == 0, \
        "row tile must be a multiple of 8 dividing H"
    assert W % tw == 0
    # TODO(synk): ragged H (not a multiple of 8) / ragged W tails unhandled.

    nrt = H // tr                       # row tiles per image
    nct = W // tw                       # width tiles per image
    n_tiles = N * nrt * nct
    rows_pt = tr + 8                    # tr+2 needed rows, rounded up to x8
    Kt = (tw + 2) * Cin                 # contraction dim per width tile
    NC = tw * Cout                      # dense output lanes per width tile
    Ntp = _round_up(NC, LANE)           # tail-only lane padding (no per-pixel pad)
    m_count = N * H * W                 # BN reduction size

    # ---- layout prep: bf16 NHWC, conv zero pad, overlapping halo tiles ------
    x_nhwc = jnp.transpose(x_nchw, (0, 2, 3, 1)).astype(jnp.bfloat16)
    x_pad = jnp.pad(x_nhwc, ((0, 0), (1, 7), (1, 1), (0, 0)))   # (N,H+8,W+2,Cin)
    tile_list = []
    for r in range(nrt):
        for c in range(nct):
            tile_list.append(
                x_pad[:, r * tr:r * tr + rows_pt, c * tw:c * tw + tw + 2, :])
    x_tiles = jnp.stack(tile_list, axis=1).reshape(n_tiles, rows_pt, Kt)

    # ---- banded (block-Toeplitz) weights, shared across ALL width tiles -----
    # Size O((tw+2)*Cin * tw*Cout): independent of W, tiny in VMEM, cheap prep.
    # TODO(synk): depends only on the weights; could be cached across calls.
    wk = jnp.transpose(w_oihw, (2, 3, 1, 0)).astype(jnp.float32)  # (3,3,Cin,Cout)
    bands = []
    for dy in range(3):
        col0 = jnp.pad(wk[dy].reshape(3 * Cin, Cout),
                       ((0, Kt - 3 * Cin), (0, 0)))               # (Kt, Cout)
        band = jnp.concatenate(
            [jnp.roll(col0, x * Cin, axis=0) for x in range(tw)], axis=1)
        bands.append(jnp.pad(band, ((0, 0), (0, Ntp - NC))))      # (Kt, Ntp)
    wband = jnp.stack(bands).astype(jnp.bfloat16)                 # (3, Kt, Ntp)

    cparams = pltpu.CompilerParams(
        dimension_semantics=("parallel",),
        vmem_limit_bytes=48 * 1024 * 1024)   # <= ~48 MiB also safe on v7x

    # ---- pass 1: conv and partial BN statistics, tiled & pipelined ----------
    conv_out, tile_sum, tile_sq = pl.pallas_call(
        _conv_stats_kernel,
        grid=(n_tiles,),
        in_specs=[
            pl.BlockSpec((1, rows_pt, Kt), lambda t: (t, 0, 0)),   # rows + halo
            pl.BlockSpec((3, Kt, Ntp), lambda t: (0, 0, 0)),       # band (resident)
        ],
        out_specs=(
            pl.BlockSpec((1, tr, Ntp), lambda t: (t, 0, 0)),
            pl.BlockSpec((1, 1, Ntp), lambda t: (t, 0, 0)),
            pl.BlockSpec((1, 1, Ntp), lambda t: (t, 0, 0)),
        ),
        out_shape=(
            jax.ShapeDtypeStruct((n_tiles, tr, Ntp), jnp.float32),
            jax.ShapeDtypeStruct((n_tiles, 1, Ntp), jnp.float32),
            jax.ShapeDtypeStruct((n_tiles, 1, Ntp), jnp.float32),
        ),
        compiler_params=cparams,
    )(x_tiles, wband)

    # ---- finalize global batch statistics (tiny tensors) --------------------
    ch_sum = jnp.sum(tile_sum[:, 0, :NC].reshape(n_tiles, tw, Cout), axis=(0, 1))
    ch_sq = jnp.sum(tile_sq[:, 0, :NC].reshape(n_tiles, tw, Cout), axis=(0, 1))
    mean = ch_sum / m_count
    var = jnp.maximum(ch_sq / m_count - mean * mean, 0.0)
    inv = jax.lax.rsqrt(var + EPS)
    scale = gamma.astype(jnp.float32) * inv
    shift = beta.astype(jnp.float32) - mean * scale

    # ---- BN + ReLU + un-tiling + NCHW, fused by XLA (no 2nd Pallas pass) ----
    y = conv_out[:, :, :NC].reshape(N, nrt, nct, tr, tw, Cout)
    y = jnp.maximum(y * scale + shift, 0.0)
    y = jnp.transpose(y, (0, 5, 1, 3, 2, 4)).reshape(N, Cout, H, W)
    return y


def reference_forward(x_nchw, w_oihw, bias, gamma, beta):
    """Pure-JAX reference reproducing PyTorch Conv2d + BatchNorm2d(train) + ReLU."""
    y = jax.lax.conv_general_dilated(
        x_nchw, w_oihw, window_strides=(1, 1), padding=((1, 1), (1, 1)),
        dimension_numbers=("NCHW", "OIHW", "NCHW"))
    y = y + bias[None, :, None, None]
    mean = jnp.mean(y, axis=(0, 2, 3), keepdims=True)
    var = jnp.mean((y - mean) ** 2, axis=(0, 2, 3), keepdims=True)
    y = (y - mean) * jax.lax.rsqrt(var + EPS)
    y = y * gamma[None, :, None, None] + beta[None, :, None, None]
    return jnp.maximum(y, 0.0)


if __name__ == "__main__":
    key = jax.random.PRNGKey(0)
    k_x, k_w, k_b = jax.random.split(key, 3)

    N, Cin, Cout, H, W = 2, 4, 8, 16, 16

    x = jax.random.normal(k_x, (N, Cin, H, W), dtype=jnp.float32)
    fan_in = Cin * 3 * 3
    bound = 1.0 / (fan_in ** 0.5)
    w = jax.random.uniform(k_w, (Cout, Cin, 3, 3), jnp.float32, -bound, bound)
    b = jax.random.uniform(k_b, (Cout,), jnp.float32, -bound, bound)
    gamma = jnp.ones((Cout,), jnp.float32)   # BN default weight
    beta = jnp.zeros((Cout,), jnp.float32)   # BN default bias

    fwd = jax.jit(conv3bn_forward)
    out = fwd(x, w, b, gamma, beta)
    jax.block_until_ready(out)

    ref = reference_forward(x, w, b, gamma, beta)
    assert out.shape == (N, Cout, H, W)
    # bf16 MXU operands (f32 accumulation) -> loosened tolerance vs f32 ref.
    assert jnp.allclose(out, ref, atol=3e-2, rtol=3e-2), (
        float(jnp.max(jnp.abs(out - ref))))

    print("KERNEL_OK")
</pallas_src>

<mosaic_0001>
module attributes {stable_mosaic.version = 11 : i64} {
  func.func @_conv_stats_kernel(%arg0: i32, %arg1: memref<1x24x72xbf16, #tpu.memory_space<vmem>>, %arg2: memref<3x72x128xbf16, #tpu.memory_space<vmem>>, %arg3: memref<1x16x128xf32, #tpu.memory_space<vmem>>, %arg4: memref<1x1x128xf32, #tpu.memory_space<vmem>>, %arg5: memref<1x1x128xf32, #tpu.memory_space<vmem>>) attributes {dimension_semantics = [#tpu.dimension_semantics<parallel>], iteration_bounds = array<i64: 2>, scalar_prefetch = 0 : i64, scratch_operands = 0 : i64, tpu.core_type = #tpu.core_type<tc>, window_params = [{transform_indices = @transform_0, window_bounds = array<i64: 1, 24, 72>}, {pipeline_mode = #tpu.pipeline_mode<synchronous>, transform_indices = @transform_1, window_bounds = array<i64: 3, 72, 128>}, {transform_indices = @transform_2, window_bounds = array<i64: 1, 16, 128>}, {transform_indices = @transform_3, window_bounds = array<i64: 1, 1, 128>}, {transform_indices = @transform_4, window_bounds = array<i64: 1, 1, 128>}]} {
    %c0 = arith.constant 0 : index
    %c0_0 = arith.constant 0 : index
    %c0_1 = arith.constant 0 : index
    %0 = vector.load %arg1[%c0, %c0_0, %c0_1] : memref<1x24x72xbf16, #tpu.memory_space<vmem>>, vector<1x16x72xbf16>
    %1 = vector.shape_cast %0 : vector<1x16x72xbf16> to vector<16x72xbf16>
    %c0_2 = arith.constant 0 : index
    %c0_3 = arith.constant 0 : index
    %c0_4 = arith.constant 0 : index
    %2 = vector.load %arg2[%c0_2, %c0_3, %c0_4] : memref<3x72x128xbf16, #tpu.memory_space<vmem>>, vector<1x72x128xbf16>
    %3 = vector.shape_cast %2 : vector<1x72x128xbf16> to vector<72x128xbf16>
    %cst = arith.constant dense<0.000000e+00> : vector<16x128xf32>
    %4 = tpu.matmul %1, %3, %cst {dimension_numbers = #tpu.dot_dimension_numbers<[1], [0], [0], [1], [0, 0, 1, 1], [], []>} : vector<16x72xbf16>, vector<72x128xbf16>, vector<16x128xf32> -> vector<16x128xf32>
    %c0_5 = arith.constant 0 : index
    %c1 = arith.constant 1 : index
    %c0_6 = arith.constant 0 : index
    %5 = vector.load %arg1[%c0_5, %c1, %c0_6] : memref<1x24x72xbf16, #tpu.memory_space<vmem>>, vector<1x16x72xbf16>
    %6 = vector.shape_cast %5 : vector<1x16x72xbf16> to vector<16x72xbf16>
    %c1_7 = arith.constant 1 : index
    %c0_8 = arith.constant 0 : index
    %c0_9 = arith.constant 0 : index
    %7 = vector.load %arg2[%c1_7, %c0_8, %c0_9] : memref<3x72x128xbf16, #tpu.memory_space<vmem>>, vector<1x72x128xbf16>
    %8 = vector.shape_cast %7 : vector<1x72x128xbf16> to vector<72x128xbf16>
    %cst_10 = arith.constant dense<0.000000e+00> : vector<16x128xf32>
    %9 = tpu.matmul %6, %8, %cst_10 {dimension_numbers = #tpu.dot_dimension_numbers<[1], [0], [0], [1], [0, 0, 1, 1], [], []>} : vector<16x72xbf16>, vector<72x128xbf16>, vector<16x128xf32> -> vector<16x128xf32>
    %10 = arith.addf %4, %9 : vector<16x128xf32>
    %c0_11 = arith.constant 0 : index
    %c2 = arith.constant 2 : index
    %c0_12 = arith.constant 0 : index
    %11 = vector.load %arg1[%c0_11, %c2, %c0_12] : memref<1x24x72xbf16, #tpu.memory_space<vmem>>, vector<1x16x72xbf16>
    %12 = vector.shape_cast %11 : vector<1x16x72xbf16> to vector<16x72xbf16>
    %c2_13 = arith.constant 2 : index
    %c0_14 = arith.constant 0 : index
    %c0_15 = arith.constant 0 : index
    %13 = vector.load %arg2[%c2_13, %c0_14, %c0_15] : memref<3x72x128xbf16, #tpu.memory_space<vmem>>, vector<1x72x128xbf16>
    %14 = vector.shape_cast %13 : vector<1x72x128xbf16> to vector<72x128xbf16>
    %cst_16 = arith.constant dense<0.000000e+00> : vector<16x128xf32>
    %15 = tpu.matmul %12, %14, %cst_16 {dimension_numbers = #tpu.dot_dimension_numbers<[1], [0], [0], [1], [0, 0, 1, 1], [], []>} : vector<16x72xbf16>, vector<72x128xbf16>, vector<16x128xf32> -> vector<16x128xf32>
    %16 = arith.addf %10, %15 : vector<16x128xf32>
    %c0_17 = arith.constant 0 : index
    %c0_18 = arith.constant 0 : index
    %c0_19 = arith.constant 0 : index
    %17 = vector.load %arg3[%c0_17, %c0_18, %c0_19] : memref<1x16x128xf32, #tpu.memory_space<vmem>>, vector<1x16x128xf32>
    %18 = vector.shape_cast %17 : vector<1x16x128xf32> to vector<16x128xf32>
    %19 = vector.shape_cast %16 : vector<16x128xf32> to vector<1x16x128xf32>
    tpu.vector_store %arg3[%c0_17, %c0_18, %c0_19], %19 {strides = array<i32>} : memref<1x16x128xf32, #tpu.memory_space<vmem>>, vector<1x16x128xf32>,
    %cst_20 = arith.constant dense<0.000000e+00> : vector<128xf32>
    %20 = vector.multi_reduction <add>, %16, %cst_20 [0] : vector<16x128xf32> to vector<128xf32>
    %21 = vector.shape_cast %20 : vector<128xf32> to vector<1x128xf32>
    %c0_21 = arith.constant 0 : index
    %c0_22 = arith.constant 0 : index
    %c0_23 = arith.constant 0 : index
    %22 = vector.load %arg4[%c0_21, %c0_22, %c0_23] : memref<1x1x128xf32, #tpu.memory_space<vmem>>, vector<1x1x128xf32>
    %23 = vector.shape_cast %22 : vector<1x1x128xf32> to vector<1x128xf32>
    %24 = vector.shape_cast %21 : vector<1x128xf32> to vector<1x1x128xf32>
    tpu.vector_store %arg4[%c0_21, %c0_22, %c0_23], %24 {strides = array<i32>} : memref<1x1x128xf32, #tpu.memory_space<vmem>>, vector<1x1x128xf32>,
    %25 = arith.mulf %16, %16 : vector<16x128xf32>
    %cst_24 = arith.constant dense<0.000000e+00> : vector<128xf32>
    %26 = vector.multi_reduction <add>, %25, %cst_24 [0] : vector<16x128xf32> to vector<128xf32>
    %27 = vector.shape_cast %26 : vector<128xf32> to vector<1x128xf32>
    %c0_25 = arith.constant 0 : index
    %c0_26 = arith.constant 0 : index
    %c0_27 = arith.constant 0 : index
    %28 = vector.load %arg5[%c0_25, %c0_26, %c0_27] : memref<1x1x128xf32, #tpu.memory_space<vmem>>, vector<1x1x128xf32>
    %29 = vector.shape_cast %28 : vector<1x1x128xf32> to vector<1x128xf32>
    %30 = vector.shape_cast %27 : vector<1x128xf32> to vector<1x1x128xf32>
    tpu.vector_store %arg5[%c0_25, %c0_26, %c0_27], %30 {strides = array<i32>} : memref<1x1x128xf32, #tpu.memory_space<vmem>>, vector<1x1x128xf32>,
    return
  }
  func.func @transform_0(%arg0: i32) -> (i32, i32, i32) {
    %c0_i32 = arith.constant 0 : i32
    %c0_i32_0 = arith.constant 0 : i32
    %c0_i32_1 = arith.constant 0 : i32
    return %arg0, %c0_i32, %c0_i32_0 : i32, i32, i32
  }
  func.func @transform_1(%arg0: i32) -> (i32, i32, i32) {
    %c0_i32 = arith.constant 0 : i32
    %c0_i32_0 = arith.constant 0 : i32
    %c0_i32_1 = arith.constant 0 : i32
    %c0_i32_2 = arith.constant 0 : i32
    return %c0_i32, %c0_i32_0, %c0_i32_1 : i32, i32, i32
  }
  func.func @transform_2(%arg0: i32) -> (i32, i32, i32) {
    %c0_i32 = arith.constant 0 : i32
    %c0_i32_0 = arith.constant 0 : i32
    %c0_i32_1 = arith.constant 0 : i32
    return %arg0, %c0_i32, %c0_i32_0 : i32, i32, i32
  }
  func.func @transform_3(%arg0: i32) -> (i32, i32, i32) {
    %c0_i32 = arith.constant 0 : i32
    %c0_i32_0 = arith.constant 0 : i32
    %c0_i32_1 = arith.constant 0 : i32
    return %arg0, %c0_i32, %c0_i32_0 : i32, i32, i32
  }
  func.func @transform_4(%arg0: i32) -> (i32, i32, i32) {
    %c0_i32 = arith.constant 0 : i32
    %c0_i32_0 = arith.constant 0 : i32
    %c0_i32_1 = arith.constant 0 : i32
    return %arg0, %c0_i32, %c0_i32_0 : i32, i32, i32
  }
}

</mosaic_0001>

<bundles_post_ra>
// kernel: squeeze.5
= control target key start
LH: loop header
LB: loop body
LE: loop exit
PB: predicated region body
PF: predicated region fallthrough
CT: control target
= control target key end

     0   :  { %vm48_vm0 = vcmask 64512   ;;  %s101_s0 = inlined_call_operand.vmem [shape: bf16[1,3,4,8], index: 0, kind: input, shape index: {}]   ;;  %s102_s1 = inlined_call_operand.vmem [shape: bf16[12,8], index: 1, kind: output, shape index: {}]  }
   0x1   :  { %v74_v0 = vld [vmem:[%s101_s0 + $0x2] sm:$0xf]   ;;  %v43_v1 = vld [vmem:[%s101_s0] sm:$0x3] }
   0x2   :  { %v15_v2 = vunpack.c.l.bf16 %v74_v0  ;;  %v44_v3 = vunpack.c.l.bf16 %v43_v1 }
   0x4   :  { %18 = vst [vmem:[#allocation1 - $0x4] sm:$0xf0] %v15_v2 }
   0x5   :  { %33 = vst [vmem:[#allocation1 + $0x10] sm:$0xf] %v15_v2 }
   0x6   :  { %46 = vst [vmem:[#allocation1 + $0x8] sm:$0xf] %v44_v3 }
   0xb   :  { %v56_v4 = vld [vmem:[#allocation1] sm:$0xf]  }
   0xc   :  { %v51_v5 = vld [vmem:[#allocation1 + $0x10] sm:$0xf]   ;;  %59 = vst.msk [vmem:[#allocation0 + $0x8] sm:$0xf] %vm48_vm0, %v56_v4  }
   0xd   :  { %v47_v6 = vld [vmem:[#allocation1 + $0x8] sm:$0xf]   ;;  %54 = vst.msk [vmem:[#allocation0 + $0x4] sm:$0xf] %vm48_vm0, %v51_v5  }
   0xe   :  { %49 = vst.msk [vmem:[#allocation0] sm:$0xf] %vm48_vm0, %v47_v6  }
  0x13   :  { %v68_v7 = vld [vmem:[#allocation0 + $0x8] sm:$0xff] }
  0x15   :  { %v62_v8 = vld [vmem:[#allocation0] sm:$0xff] }
  0x16   :  { %v80_v9 = vpack.c.bf16 %v68_v7, %v62_v8 }
  0x18   :  { %81 = vst [vmem:[%s102_s1] sm:$0xff] %v80_v9  }

// kernel: conv3bn_forward.1
= control target key start
LH: loop header
LB: loop body
LE: loop exit
PB: predicated region body
PF: predicated region fallthrough
CT: control target
= control target key end

     0   :  { %s687_s15 = smov 0   ;;  %s761_s0 = inlined_call_operand.vmem [shape: bf16[2,24,72], index: 0, kind: input, shape index: {}]   ;;  %s762_s1 = inlined_call_operand.vmem [shape: bf16[3,72,128], index: 1, kind: input, shape index: {}]   ;;  %s763_s2 = inlined_call_operand.vmem [shape: f32[2,16,128], index: 2, kind: output, shape index: {0}]   ;;  %s764_s3 = inlined_call_operand.vmem [shape: f32[2,1,128], index: 3, kind: output, shape index: {1}]   ;;  %s765_s4 = inlined_call_operand.vmem [shape: f32[2,1,128], index: 4, kind: output, shape index: {2}]  }
   0x1 LB: > { %s546_s16 = sadd.s32 4294967295, %s660_s15   ;;  %p550_p0 = scmp.ge.s32.totalorder %s660_s15, 1  ;;  %s660_s15 = sphi %s687_s15, %s15_s15  }
   0x2   : > { %p167_p1 = scmp.lt.s32.totalorder %s660_s15, 3 }
   0x4   : > { %p168_p2 = pnand %p550_p0, %p167_p1 }
   0x5   : > { %p199_p3 = scmp.lt.s32.totalorder (!%p168_p2), %s546_s16, 1 }
   0x6   : > { %171 = sbr.rel (%p168_p2) target bundleno = 196 (0xc4), region = 28 }
   0xb   : > { %v562_v0 = vld [vmem:[%s762_s1 + $0x44] sm:$0xf]  ;;  %v226_v1 = vld [vmem:[%s762_s1 + $0x20] sm:$0xf]  ;;  %v605_v4 = vld [vmem:[%s762_s1 + $0x68] sm:$0xf] }
   0xc   : > { %v276_v2 = vunpack.c.l.b16 %v562_v0  ;;  %v325_v3 = vunpack.c.l.b16 %v226_v1  ;;  %vm290_vm0 = vcmask 1043456   ;;  %v389_v5 = vunpack.c.l.b16 %v605_v4  ;;  %s767_s16 = smov (!%p199_p3, %s546_s16), 1  ;;  %v633_v12 = vld [vmem:[%s762_s1 + $0x3c] sm:$0xff]  ;;  %v632_v18 = vld [vmem:[%s762_s1 + $0x34] sm:$0xff]  ;;  %v631_v25 = vld [vmem:[%s762_s1 + $0x2c] sm:$0xff] }
   0xd   : > { %s645_s23 = smul.u32 12, %s767_s16  ;;  %v629_v13 = vld [vmem:[%s762_s1 + $0x18] sm:$0xff]  ;;  %v637_v14 = vld [vmem:[%s762_s1 + $0x60] sm:$0xff]  ;;  %v628_v19 = vld [vmem:[%s762_s1 + $0x10] sm:$0xff]  ;;  %vm246_vm1 = vsmask.f32 7424  ;;  %s211_s7 = scalar_lea.vmem %s764_s3, %s767_s16 }
   0xe   : > { %v281_v6 = vpack.c.b16 %v276_v2, %v276_v2  ;;  %v330_v7 = vpack.c.b16 %v325_v3, %v325_v3  ;;  %v394_v8 = vpack.c.b16 %v389_v5, %v389_v5  ;;  %v636_v21 = vld [vmem:[%s762_s1 + $0x58] sm:$0xff]  ;;  %v627_v26 = vld [vmem:[%s762_s1 + $0x8] sm:$0xff]  ;;  %v635_v30 = vld [vmem:[%s762_s1 + $0x50] sm:$0xff]  ;;  %vm368_vm2 = vcmask 1046528   ;;  %s625_s27 = sshll.u32 %s767_s16, 4  ;;  %s214_s10 = scalar_lea.vmem %s765_s4, %s767_s16 }
   0xf   : > { %s203_s6 = scalar_lea.vmem %s761_s0, %s645_s23  ;;  %v630_v32 = vld [vmem:[%s762_s1 + $0x24] sm:$0xff]  ;;  %vm286_vm3 = vcmask 588800   ;;  %s208_s30 = scalar_lea.vmem %s763_s2, %s625_s27 }
  0x10   : > { %v292_v9 = vsel %vm290_vm0, %v281_v6, 0  ;;  %v338_v10 = vsel %vm290_vm0, %v330_v7, 0  ;;  %v403_v11 = vsel %vm290_vm0, %v394_v8, 0  ;;  %v639_v15 = vld [vmem:[%s203_s6] sm:$0xff]   ;;  %v227_v16 = vld [vmem:[%s203_s6 + $0x8] sm:$0x1] }
  0x11   : > { %297 = vmatpush.bf16.msra.mxu0 %v292_v9  ;;  %343 = vmatpush.bf16.msra.mxu1 %v338_v10  ;;  %v243_v17 = vunpack.c.l.b16 %v227_v16  ;;  %v250_v20 = vshll.u32 %v639_v15, 16  ;;  %v642_v23 = vld [vmem:[%s203_s6] sm:$0xf0]  ;;  %v643_v24 = vld [vmem:[%s203_s6] sm:$0xe]  ;;  %v248_v27 = vshrl.u32 %v639_v15, 16 }
  0x12   : > { %408 = vmatpush.bf16.msra.mxu2 %v403_v11  ;;  %v644_v31 = vor.u32 %v643_v24, %v642_v23  ;;  %v626_v33 = vld [vmem:[%s762_s1] sm:$0xff]  ;;  %v634_v36 = vld [vmem:[%s762_s1 + $0x48] sm:$0xff] }
  0x13   : > { %v245_v22 = vpack.c.b16 %v243_v17, %v243_v17  ;;  %v252_v28 = vrot.slane %v250_v20, 1 }
  0x14   : > { %v369_v37 = vrot.slane %v644_v31, 1 }
  0x15   : > { %298 = vmatpush.bf16.msra.mxu0 %v633_v12  ;;  %344 = vmatpush.bf16.msra.mxu1 %v629_v13  ;;  %v255_v29 = vshll.u32 %v245_v22, 16  ;;  %v253_v34 = vor.u32 %v252_v28, %v248_v27  ;;  %v370_v38 = vrot.slane %v245_v22, 1 }
  0x16   : > { %409 = vmatpush.bf16.msra.mxu2 %v637_v14 }
  0x17   : > { %v257_v35 = vrot.slane %v255_v29, 1  ;;  %v371_v40 = vsel %vm368_vm2, %v369_v37, %v370_v38 }
  0x19   : > { %299 = vmatpush.bf16.msra.mxu0 %v632_v18  ;;  %345 = vmatpush.bf16.msra.mxu1 %v628_v19  ;;  %v258_v39 = vsel %vm246_vm1, %v253_v34, %v257_v35 }
  0x1a   : > { %410 = vmatpush.bf16.msra.mxu2 %v636_v21 }
  0x1d   : > { %300 = vmatpush.bf16.msra.mxu0 %v631_v25  ;;  %346 = vmatpush.bf16.msra.mxu1 %v627_v26 }
  0x1e   : > { %411 = vmatpush.bf16.msra.mxu2 %v635_v30 }
  0x21   : > { %301 = vmatpush.bf16.msra.mxu0 %v630_v32  ;;  %347 = vmatpush.bf16.msra.mxu1 %v626_v33 }
  0x22   : > { %412 = vmatpush.bf16.msra.mxu2 %v634_v36 }
  0x24   : > { %579 = vmatmul.msk.bf16.vlgmr.msra.gmra.mxu0 %vm286_vm3, %v258_v39  ;;  %596 = vmatmul.msk.bf16.vlgmr.msra.gmra.mxu1 %vm286_vm3, %v639_v15 }
  0x25   : > { %622 = vmatmul.msk.bf16.vlgmr.msra.gmra.mxu2 %vm286_vm3, %v371_v40 }
  0xa1   : > { %v303_v41 = vpop.f32.mrf.mxu0  ;;  %v349_v42 = vpop.f32.mrf.mxu1 }
  0xa2   : > { %v350_v43 = vadd.f32 %v349_v42, %v303_v41 }
  0xa8   : > { %v414_v44 = vpop.f32.mrf.mxu2 }
  0xa9   : > { %v419_v45 = vadd.f32 %v414_v44, %v350_v43  ;;  %v305_v46 = vpop.f32.mrf.mxu0  ;;  %v351_v47 = vpop.f32.mrf.mxu1 }
  0xaa   : > { %v352_v48 = vadd.f32 %v351_v47, %v305_v46 }
  0xab   : > { %421 = vst [vmem:[%s208_s30] sm:$0xff] %v419_v45  ;;  %v431_v51 = vmul.f32 %v419_v45, %v419_v45 }
  0xb0   : > { %v416_v49 = vpop.f32.mrf.mxu2 }
  0xb1   : > { %v420_v50 = vadd.f32 %v416_v49, %v352_v48 }
  0xb3   : > { %422 = vst [vmem:[%s208_s30 + $0x8] sm:$0xff] %v420_v50  ;;  %v423_v52 = vadd.f32 %v420_v50, %v419_v45  ;;  %v432_v53 = vmul.f32 %v420_v50, %v420_v50 }
  0xb5   : > { %v424_v54 = vrot.slane %v423_v52, 4  ;;  %v433_v55 = vadd.f32 %v432_v53, %v431_v51 }
  0xb7   : > { %v425_v56 = vadd.f32 %v424_v54, %v423_v52  ;;  %v434_v57 = vrot.slane %v433_v55, 4 }
  0xb9   : > { %v426_v58 = vrot.slane %v425_v56, 2  ;;  %v435_v59 = vadd.f32 %v434_v57, %v433_v55 }
  0xbb   : > { %v427_v60 = vadd.f32 %v426_v58, %v425_v56  ;;  %v436_v61 = vrot.slane %v435_v59, 2 }
  0xbd   : > { %v428_v62 = vrot.slane %v427_v60, 1  ;;  %v437_v63 = vadd.f32 %v436_v61, %v435_v59 }
  0xbf   : > { %v429_v0 = vadd.f32 %v428_v62, %v427_v60  ;;  %v438_v1 = vrot.slane %v437_v63, 1 }
  0xc1   : > { %430 = vst [vmem:[%s211_s7] sm:$0x1] %v429_v0  ;;  %v439_v2 = vadd.f32 %v438_v1, %v437_v63 }
  0xc3   : > { %440 = vst [vmem:[%s214_s10] sm:$0x1] %v439_v2 }
  0xc4 PF: > { %s15_s15 = sadd.s32 1, %s660_s15  }
  0xc5   : > { %p12_p4 = scmp.ge.s32.totalorder %s15_s15, 4  }
  0xc7   :  { %14 = sbr.rel (!%p12_p4) target bundleno = 1 (0x1), region = 84 }

</bundles_post_ra>
